<compile_context>
chip_gen: v7x
topology: tpu7x:2x2x1
jax: 0.10.0
libtpu: 0.0.40
codegen_flags: <defaults>
</compile_context>

<pallas_src>
import functools

import jax
import jax.numpy as jnp
import numpy as np
from jax import lax
from jax.experimental import pallas as pl
from jax.experimental.pallas import tpu as pltpu

EPS = 1e-5  # nn.InstanceNorm2d default eps


# ---------------------------------------------------------------------------
# Fused kernel, one grid step = Nb batch items:
#   y_n   = W @ x_n                       (1x1 conv as (Cout,Cin)@(Cin,HWp) matmul)
#   scale = gamma * rsqrt(var_n + eps)    (biased var over true HW, f32 one-pass)
#   shift = beta - mean_n * scale
#   o_n   = relu(y_n * scale + shift)     (ReLU only if use_activation)
# ---------------------------------------------------------------------------
def _channel_compression_kernel(x_ref, w_ref, g_ref, b_ref, o_ref, *,
                                use_activation, nb, inv_hw):
    # x_ref: (Nb, Cin, HWp)  w_ref: (Cout, Cin)  g_ref/b_ref: (Cout, 1) f32
    # o_ref: (Nb, Cout, HWp)
    w = w_ref[...]                                   # (Cout, Cin), native dtype
    g = g_ref[...]                                   # (Cout, 1) f32
    b = b_ref[...]                                   # (Cout, 1) f32

    for i in range(nb):                              # small static unroll
        x = x_ref[i]                                 # (Cin, HWp), native dtype
        # 1x1 conv == channel matmul; HW stays on the lane axis (lane-dense).
        y = jnp.dot(w, x, preferred_element_type=jnp.float32)   # (Cout, HWp) f32

        # One-pass InstanceNorm stats in f32.  Zero-padded lanes (if HW was
        # padded) contribute 0 to both sums; divide by the *true* HW.
        s = jnp.sum(y, axis=1, keepdims=True)                    # (Cout, 1)
        ss = jnp.sum(y * y, axis=1, keepdims=True)                # (Cout, 1)
        mean = s * inv_hw
        var = jnp.maximum(ss * inv_hw - mean * mean, 0.0)         # guard cancellation

        # Fold affine into scale/shift: 2 VPU ops per element on the slab.
        scale = g * lax.rsqrt(var + EPS)                           # (Cout, 1)
        shift = b - mean * scale                                   # (Cout, 1)
        z = y * scale + shift

        if use_activation:
            z = jnp.maximum(z, 0.0)

        o_ref[i] = z.astype(o_ref.dtype)


# ---------------------------------------------------------------------------
# Wrapper: NCHW in / NCHW out (PyTorch convention), native dtype in/out.
# ---------------------------------------------------------------------------
def channel_compression_forward(x_nchw, w, gamma, beta, use_activation=True):
    N, Cin, H, W = x_nchw.shape
    Cout = w.shape[0]
    HW = H * W
    dtype = x_nchw.dtype
    itemsize = jnp.dtype(dtype).itemsize

    # Lane-dense layout: (N, C, HW); pad HW up to a multiple of 128 if needed so
    # stores stay unmasked.  Stats inside the kernel divide by the true HW.
    HWp = (-(-HW // 128)) * 128
    x = x_nchw.reshape(N, Cin, HW)                    # contiguous reshape (free)
    if HWp != HW:
        x = jnp.pad(x, ((0, 0), (0, 0), (0, HWp - HW)))

    w2 = w.reshape(Cout, Cin).astype(dtype)           # (Cout,Cin,1,1) -> (Cout,Cin)
    g2 = gamma.reshape(Cout, 1).astype(jnp.float32)
    b2 = beta.reshape(Cout, 1).astype(jnp.float32)

    # --- pick Nb: ~1 MiB of x+out per grid step, bounded by a VMEM budget that
    # fits v7x (64 MiB physical), and >= 2 grid steps when N >= 2 (v7x 2 TCs).
    bytes_per_item = (Cin + Cout) * HWp * itemsize
    target_bytes = 1 << 20
    vmem_budget = 40 * 1024 * 1024                     # double-buffered blocks
    nb = max(1, min(N, target_bytes // max(1, bytes_per_item)))
    while nb > 1 and 2 * nb * bytes_per_item > vmem_budget:
        nb -= 1
    if N >= 2:
        nb = min(nb, -(-N // 2))                       # keep grid length >= 2
    while N % nb != 0:                                 # no ragged boundary blocks
        nb -= 1
    grid_n = N // nb

    # Raise the scoped VMEM limit only when the blocks need it (v5e default is
    # 16 MiB); keep <= 48 MiB so v7x (64 MiB physical) retains headroom.
    vmem_needed = 4 * nb * bytes_per_item
    vmem_limit = 48 * 1024 * 1024 if vmem_needed > 16 * 1024 * 1024 else None

    out = pl.pallas_call(
        functools.partial(_channel_compression_kernel,
                          use_activation=use_activation, nb=nb, inv_hw=1.0 / HW),
        out_shape=jax.ShapeDtypeStruct((N, Cout, HWp), dtype),
        grid=(grid_n,),
        in_specs=[
            pl.BlockSpec((nb, Cin, HWp), lambda n: (n, 0, 0)),
            pl.BlockSpec((Cout, Cin), lambda n: (0, 0)),
            pl.BlockSpec((Cout, 1), lambda n: (0, 0)),
            pl.BlockSpec((Cout, 1), lambda n: (0, 0)),
        ],
        out_specs=pl.BlockSpec((nb, Cout, HWp), lambda n: (n, 0, 0)),
        compiler_params=pltpu.CompilerParams(
            dimension_semantics=("parallel",),
            vmem_limit_bytes=vmem_limit),
    )(x, w2, g2, b2)

    if HWp != HW:
        out = out[:, :, :HW]
    return out.reshape(N, Cout, H, W)


# ---------------------------------------------------------------------------
# Pure-JAX reference mirroring the PyTorch module (NCHW) for verification.
# ---------------------------------------------------------------------------
def torch_style_reference(x, w_oihw, gamma, beta, use_activation=True):
    x = x.astype(jnp.float32)
    w_oihw = w_oihw.astype(jnp.float32)
    y = lax.conv_general_dilated(
        x, w_oihw, window_strides=(1, 1), padding=((0, 0), (0, 0)),
        dimension_numbers=("NCHW", "OIHW", "NCHW"))
    mean = jnp.mean(y, axis=(2, 3), keepdims=True)
    var = jnp.mean(jnp.square(y - mean), axis=(2, 3), keepdims=True)
    z = (y - mean) * lax.rsqrt(var + EPS)
    z = z * gamma.reshape(1, -1, 1, 1) + beta.reshape(1, -1, 1, 1)
    return jnp.maximum(z, 0.0) if use_activation else z


# ---------------------------------------------------------------------------
if __name__ == "__main__":
    key = jax.random.PRNGKey(0)
    k0, k1, k2, k3 = jax.random.split(key, 4)

    N, Cin, Cout, H, W = 2, 8, 4, 16, 16   # channel compression 8 -> 4

    x = jax.random.normal(k0, (N, Cin, H, W), jnp.float32)
    # PyTorch layout: Conv2d weight (Cout, Cin, 1, 1), bias=False;
    # InstanceNorm2d affine weight/bias (Cout,)
    w_oihw = 0.2 * jax.random.normal(k1, (Cout, Cin, 1, 1), jnp.float32)
    gamma = 1.0 + 0.1 * jax.random.normal(k2, (Cout,), jnp.float32)
    beta = 0.1 * jax.random.normal(k3, (Cout,), jnp.float32)

    # f32 path: strict check vs the PyTorch-style reference.
    out = jax.block_until_ready(
        channel_compression_forward(x, w_oihw, gamma, beta, use_activation=True))
    assert out.shape == (N, Cout, H, W), out.shape
    ref = jax.block_until_ready(
        torch_style_reference(x, w_oihw, gamma, beta, use_activation=True))
    np.testing.assert_allclose(np.asarray(out), np.asarray(ref), atol=1e-4, rtol=1e-4)

    # bf16 path: native-dtype I/O (no wrapper f32 cast), sanity check only.
    out_bf16 = jax.block_until_ready(
        channel_compression_forward(x.astype(jnp.bfloat16),
                                    w_oihw.astype(jnp.bfloat16),
                                    gamma, beta, use_activation=True))
    assert out_bf16.dtype == jnp.bfloat16
    assert out_bf16.shape == (N, Cout, H, W)
    assert bool(jnp.all(jnp.isfinite(out_bf16.astype(jnp.float32))))

    print("KERNEL_OK")
</pallas_src>

<mosaic_0001>
module attributes {stable_mosaic.version = 11 : i64} {
  func.func @_channel_compression_kernel(%arg0: i32, %arg1: memref<1x8x256xf32, #tpu.memory_space<vmem>>, %arg2: memref<4x8xf32, #tpu.memory_space<vmem>>, %arg3: memref<4x1xf32, #tpu.memory_space<vmem>>, %arg4: memref<4x1xf32, #tpu.memory_space<vmem>>, %arg5: memref<1x4x256xf32, #tpu.memory_space<vmem>>) attributes {dimension_semantics = [#tpu.dimension_semantics<parallel>], iteration_bounds = array<i64: 2>, scalar_prefetch = 0 : i64, scratch_operands = 0 : i64, tpu.core_type = #tpu.core_type<tc>, window_params = [{transform_indices = @transform_0, window_bounds = array<i64: 1, 8, 256>}, {pipeline_mode = #tpu.pipeline_mode<synchronous>, transform_indices = @transform_1, window_bounds = array<i64: 4, 8>}, {pipeline_mode = #tpu.pipeline_mode<synchronous>, transform_indices = @transform_2, window_bounds = array<i64: 4, 1>}, {pipeline_mode = #tpu.pipeline_mode<synchronous>, transform_indices = @transform_3, window_bounds = array<i64: 4, 1>}, {transform_indices = @transform_4, window_bounds = array<i64: 1, 4, 256>}]} {
    %c0 = arith.constant 0 : index
    %c0_0 = arith.constant 0 : index
    %0 = vector.load %arg2[%c0, %c0_0] : memref<4x8xf32, #tpu.memory_space<vmem>>, vector<4x8xf32>
    %c0_1 = arith.constant 0 : index
    %c0_2 = arith.constant 0 : index
    %1 = vector.load %arg3[%c0_1, %c0_2] : memref<4x1xf32, #tpu.memory_space<vmem>>, vector<4x1xf32>
    %c0_3 = arith.constant 0 : index
    %c0_4 = arith.constant 0 : index
    %2 = vector.load %arg4[%c0_3, %c0_4] : memref<4x1xf32, #tpu.memory_space<vmem>>, vector<4x1xf32>
    %c0_5 = arith.constant 0 : index
    %c0_6 = arith.constant 0 : index
    %c0_7 = arith.constant 0 : index
    %3 = vector.load %arg1[%c0_5, %c0_6, %c0_7] : memref<1x8x256xf32, #tpu.memory_space<vmem>>, vector<1x8x256xf32>
    %4 = vector.shape_cast %3 : vector<1x8x256xf32> to vector<8x256xf32>
    %cst = arith.constant dense<0.000000e+00> : vector<4x256xf32>
    %5 = tpu.matmul %0, %4, %cst {dimension_numbers = #tpu.dot_dimension_numbers<[1], [0], [0], [1], [0, 0, 1, 1], [], []>} : vector<4x8xf32>, vector<8x256xf32>, vector<4x256xf32> -> vector<4x256xf32>
    %cst_8 = arith.constant dense<0.000000e+00> : vector<4xf32>
    %6 = vector.multi_reduction <add>, %5, %cst_8 [1] : vector<4x256xf32> to vector<4xf32>
    %7 = vector.shape_cast %6 : vector<4xf32> to vector<4x1xf32>
    %8 = arith.mulf %5, %5 : vector<4x256xf32>
    %cst_9 = arith.constant dense<0.000000e+00> : vector<4xf32>
    %9 = vector.multi_reduction <add>, %8, %cst_9 [1] : vector<4x256xf32> to vector<4xf32>
    %10 = vector.shape_cast %9 : vector<4xf32> to vector<4x1xf32>
    %cst_10 = arith.constant 3.906250e-03 : f32
    %11 = vector.broadcast %cst_10 : f32 to vector<4x1xf32>
    %12 = arith.mulf %7, %11 : vector<4x1xf32>
    %cst_11 = arith.constant 3.906250e-03 : f32
    %13 = vector.broadcast %cst_11 : f32 to vector<4x1xf32>
    %14 = arith.mulf %10, %13 : vector<4x1xf32>
    %15 = arith.mulf %12, %12 : vector<4x1xf32>
    %16 = arith.subf %14, %15 : vector<4x1xf32>
    %cst_12 = arith.constant 0.000000e+00 : f32
    %17 = vector.broadcast %cst_12 : f32 to vector<4x1xf32>
    %18 = arith.maximumf %16, %17 : vector<4x1xf32>
    %cst_13 = arith.constant 9.99999974E-6 : f32
    %19 = vector.broadcast %cst_13 : f32 to vector<4x1xf32>
    %20 = arith.addf %18, %19 : vector<4x1xf32>
    %21 = math.rsqrt %20 : vector<4x1xf32>
    %22 = arith.mulf %1, %21 : vector<4x1xf32>
    %23 = arith.mulf %12, %22 : vector<4x1xf32>
    %24 = arith.subf %2, %23 : vector<4x1xf32>
    %25 = vector.broadcast %22 : vector<4x1xf32> to vector<4x256xf32>
    %26 = arith.mulf %5, %25 : vector<4x256xf32>
    %27 = vector.broadcast %24 : vector<4x1xf32> to vector<4x256xf32>
    %28 = arith.addf %26, %27 : vector<4x256xf32>
    %cst_14 = arith.constant 0.000000e+00 : f32
    %29 = vector.broadcast %cst_14 : f32 to vector<4x256xf32>
    %30 = arith.maximumf %28, %29 : vector<4x256xf32>
    %c0_15 = arith.constant 0 : index
    %c0_16 = arith.constant 0 : index
    %c0_17 = arith.constant 0 : index
    %31 = vector.load %arg5[%c0_15, %c0_16, %c0_17] : memref<1x4x256xf32, #tpu.memory_space<vmem>>, vector<1x4x256xf32>
    %32 = vector.shape_cast %31 : vector<1x4x256xf32> to vector<4x256xf32>
    %33 = vector.shape_cast %30 : vector<4x256xf32> to vector<1x4x256xf32>
    tpu.vector_store %arg5[%c0_15, %c0_16, %c0_17], %33 {strides = array<i32>} : memref<1x4x256xf32, #tpu.memory_space<vmem>>, vector<1x4x256xf32>,
    return
  }
  func.func @transform_0(%arg0: i32) -> (i32, i32, i32) {
    %c0_i32 = arith.constant 0 : i32
    %c0_i32_0 = arith.constant 0 : i32
    %c0_i32_1 = arith.constant 0 : i32
    return %arg0, %c0_i32, %c0_i32_0 : i32, i32, i32
  }
  func.func @transform_1(%arg0: i32) -> (i32, i32) {
    %c0_i32 = arith.constant 0 : i32
    %c0_i32_0 = arith.constant 0 : i32
    %c0_i32_1 = arith.constant 0 : i32
    return %c0_i32, %c0_i32_0 : i32, i32
  }
  func.func @transform_2(%arg0: i32) -> (i32, i32) {
    %c0_i32 = arith.constant 0 : i32
    %c0_i32_0 = arith.constant 0 : i32
    %c0_i32_1 = arith.constant 0 : i32
    return %c0_i32, %c0_i32_0 : i32, i32
  }
  func.func @transform_3(%arg0: i32) -> (i32, i32) {
    %c0_i32 = arith.constant 0 : i32
    %c0_i32_0 = arith.constant 0 : i32
    %c0_i32_1 = arith.constant 0 : i32
    return %c0_i32, %c0_i32_0 : i32, i32
  }
  func.func @transform_4(%arg0: i32) -> (i32, i32, i32) {
    %c0_i32 = arith.constant 0 : i32
    %c0_i32_0 = arith.constant 0 : i32
    %c0_i32_1 = arith.constant 0 : i32
    return %arg0, %c0_i32, %c0_i32_0 : i32, i32, i32
  }
}

</mosaic_0001>

<bundles_post_ra>
// kernel: tpu_custom_call.1
= control target key start
LH: loop header
LB: loop body
LE: loop exit
PB: predicated region body
PF: predicated region fallthrough
CT: control target
= control target key end

     0   :  { %9 = vsyncpa [#allocation3], 0  ;;  %s790_s0 = inlined_call_operand.hbm [shape: f32[2,8,256], index: 0, kind: input, shape index: {}]   ;;  %s791_s1 = inlined_call_operand.vmem [shape: f32[4,8], index: 1, kind: input, shape index: {}]   ;;  %s792_s2 = inlined_call_operand.vmem [shape: f32[4,1], index: 2, kind: input, shape index: {}]   ;;  %s793_s3 = inlined_call_operand.vmem [shape: f32[4,1], index: 3, kind: input, shape index: {}]   ;;  %s794_s4 = inlined_call_operand.hbm [shape: f32[2,4,256], index: 4, kind: output, shape index: {}]  }
   0x1   :  { %11 = vsyncpa [#allocation3 + $0x1], 0 }
   0x2   :  { %12 = vsyncpa [#allocation4], 0 }
   0x3   :  { %14 = vsyncpa [#allocation4 + $0x1], 0  ;;  %s619_s15 = smov 0   ;;  %s621_s16 = smov 0  }
   0x4   :  { %s623_s17 = smov 0   ;;  %s625_s18 = smov 0  }
   0x5 LB: > { %s640_s19 = sadd.s32 4294967295, %s588_s18   ;;  %s423_s20 = sadd.s32 4294967294, %s588_s18   ;;  %s588_s18 = sphi %s625_s18, %s809_s18   ;;  %s584_s17 = sphi %s623_s17, %s808_s17   ;;  %s580_s16 = sphi %s621_s16, %s807_s16   ;;  %s576_s15 = sphi %s619_s15, %s806_s15  }
   0x6   : > { %s644_s21 = sadd.s32 1, %s588_s18   ;;  %s27_s22 = sadd.s32 1, %s584_s17 }
   0x7   : > { %s24_s23 = ssub.s32 %s588_s18, %s644_s21  ;;  %p34_p0 = scmp.ne.s32.totalorder %s584_s17, %s580_s16 }
   0x8   : > { %p25_p1 = scmp.eq.s32.totalorder %s24_s23, 0  ;;  %p35_p2 = scmp.eq.s32.totalorder %s588_s18, 0 }
   0x9   : > { %p40_p3 = scmp.ne.s32.totalorder %s580_s16, %s576_s15  ;;  %p41_p4 = scmp.eq.s32.totalorder %s640_s19, 0 }
   0xa   : > { %s656_s24 = scalar_select %p25_p1, %s584_s17, %s27_s22  }
   0xb   : > { %p658_p5 = por %p35_p2, %p34_p0  ;;  %p662_p6 = por %p41_p4, %p40_p3 }
   0xc   : > { %p127_p7 = scmp.eq.s32.totalorder %s640_s19, 1  ;;  %p133_p8 = scmp.eq.s32.totalorder %s423_s20, 1 }
   0xd   : > { %p452_p10 = scmp.lt.s32.totalorder %s588_s18, 2  ;;  %s162_s29 = sand.u32 1, %s584_s17  }
   0xe   : > { %p669_p11 = por %p127_p7, %p34_p0  ;;  %p673_p12 = por %p133_p8, %p40_p3 }
   0xf   : > { %s438_s30 = sshll.u32 %s588_s18, 8  ;;  %s426_s5 = sshll.u32 %s162_s29, 4 }
  0x10   : > { %s798_s27 = scalar_select %p669_p11, 1, 0 }
  0x11   : > { %s799_s28 = scalar_select %p673_p12, 1, 0 }
  0x12   : > { %s682_s8 = scalar_lea.hbm %s790_s0, %s438_s30  ;;  %s166_s9 = scalar_lea.vmem [#allocation2], %s426_s5 }
  0x13   : > { %s174_s10 = sshll.u32 %s166_s9, 4  ;;  %p686_p13 = pnand %p452_p10, %p658_p5  ;;  %s690_s10 = int_to_ptr.vmem [resolvable:$true] %s174_s10 }
  0x14   : > { %s163_s12 = scalar_lea.sflag [#allocation3], %s162_s29  ;;  %s492_s13 = scalar_lea.hbm %s682_s8, 256 }
  0x15   : > { %p493_p2 = scmp.ne.s32.totalorder %s682_s8, %s492_s13  ;;  %p494_p3 = pneg %p686_p13 }
  0x16   : > { %s497_s22 = scalar_lea.hbm %s790_s0, 512  ;;  %p498_p5 = scmp.lt.u32.totalorder %s682_s8, %s790_s0 }
  0x17   : > { %p495_p4 = pnand %p494_p3, %p493_p2  ;;  %p499_p8 = scmp.lt.u32.totalorder %s497_s22, %s492_s13 }
  0x18   : > { %p501_p9 = scmp.lt.u32.totalorder %s492_s13, %s682_s8 }
  0x19   : > { %p496_p7 = pneg %p495_p4  ;;  %p500_p10 = por %p499_p8, %p498_p5 }
  0x1b   : > { %p502_p0 = por %p501_p9, %p500_p10 }
  0x1d   : > { %p503_p1 = pnand %p502_p0, %p496_p7 }
  0x1f   : > { %506 = shalt.err (!%p503_p1)
}
  0x20   : > { %s507_s29 = scalar_lea.vmem %s690_s10, 256  ;;  %s590_s30 = smov [#allocation2]  }
  0x21   : > { %p508_p2 = scmp.ne.s32.totalorder %s690_s10, %s507_s29  ;;  %s512_s5 = sshll.u32 %s590_s30, 4  ;;  %s513_s5 = int_to_ptr.vmem [resolvable:$false] %s512_s5 }
  0x22   : > { %s514_s6 = scalar_lea.vmem %s513_s5, 512  ;;  %p515_p11 = scmp.lt.s32.totalorder %s690_s10, %s513_s5 }
  0x23   : > { %p510_p4 = pnand %p508_p2, %p494_p3  ;;  %p516_p5 = scmp.lt.s32.totalorder %s514_s6, %s507_s29 }
  0x25   : > { %p511_p12 = pneg %p510_p4  ;;  %p517_p8 = por %p516_p5, %p515_p11 }
  0x27   : > { %p518_p9 = pnand %p517_p8, %p511_p12 }
  0x29   : > { %521 = shalt.err (!%p518_p9)
}
  0x2a   : > { %447 = dma.hbm_to_vmem [thread:$0]  (!%p686_p13), %s682_s8, 256, %s690_s10, %s163_s12  }
  0x2b   : > { %p801_p0 = scmp.lt.s32.totalorder %s588_s18, 3  ;;  %p802_p1 = scmp.ge.s32.totalorder %s588_s18, 1 }
  0x2d   : > { %p180_p3 = pnand %p802_p1, %p801_p0 }
  0x2e   : > { %s724_s7 = sand.u32 (!%p180_p3), 1, %s580_s16  }
  0x2f   : > { %183 = sbr.rel (%p180_p3) target bundleno = 593 (0x251), region = 36  ;;  %s430_s9 = sshll.u32 (!%p180_p3), %s724_s7, 4 }
  0x30   : > { %s186_s13 = scalar_lea.sflag (!%p180_p3), [#allocation3], %s724_s7  ;;  %s189_s14 = scalar_lea.vmem (!%p180_p3), [#allocation2], %s430_s9 }
  0x36   : > { %567 = dma.done.wait (%p662_p6), %s186_s13, 256  }
  0x37   : > { %569 = vsyncadd (%p662_p6), %s186_s13, 4294967040  ;;  %v591_v0 = vmov 0.0   ;;  %v218_v1 = vld [vmem:[%s189_s14 + $0x8] sm:$0xff]  ;;  %v217_v2 = vld [vmem:[%s189_s14] sm:$0xff]  ;;  %vm219_vm0 = vcmask 64512   ;;  %vm294_vm1 = vcmask 1043456  }
  0x38   : > { %287 = vmatprep.mubr.f32.mxu0 %v591_v0  ;;  %v214_v3 = vld [vmem:[%s791_s1] sm:$0xf]  ;;  %223 = vmatprep.subr.mxu0 %v218_v1  ;;  %v592_v14 = vmov 0   ;;  %s431_s22 = sshll.u32 %s724_s7, 3  ;;  %s439_s23 = sshll.u32 %s640_s19, 7 }
  0x39   : > { %224 = vmatpush1.msra.mxu0 %v217_v2  ;;  %488 = vset.pattern.permute.xlu1 %v592_v14  ;;  %v215_v23 = vld [vmem:[%s792_s2] sm:$0xf]  ;;  %s213_s25 = scalar_lea.vmem [#allocation5], %s431_s22  ;;  %s746_s6 = scalar_lea.hbm %s794_s4, %s439_s23 }
  0x3a   : > { %432 = vmatmul.mubr.msk.f32.vlgmr.msra.gmra.mrb[0].mxu0 %vm219_vm0, %v214_v3  ;;  %489 = vset.pattern.permute.xlu0 %v592_v14  ;;  %v216_v26 = vld [vmem:[%s793_s3] sm:$0xf]  ;;  %s353_s29 = sshll.u32 %s213_s25, 4  ;;  %s339_s9 = scalar_lea.sflag [#allocation4], %s724_s7  ;;  %s748_s29 = int_to_ptr.vmem [resolvable:$true] %s353_s29 }
  0x3b   : > { %s522_s13 = scalar_lea.vmem %s748_s29, 128  ;;  %p803_p11 = scmp.ne.s32.totalorder %s798_s27, 0 }
  0x3c   : > { %p523_p6 = scmp.ne.s32.totalorder %s748_s29, %s522_s13  ;;  %s593_s19 = smov [#allocation5]  }
  0x3d   : > { %s526_s14 = sshll.u32 %s593_s19, 4  ;;  %s527_s14 = int_to_ptr.vmem [resolvable:$false] %s526_s14 }
  0x3e   : > { %p524_p12 = pnand %p523_p6, %p803_p11  ;;  %s528_s8 = scalar_lea.vmem %s527_s14, 256 }
  0x3f   : > { %p529_p7 = scmp.lt.s32.totalorder %s748_s29, %s527_s14  ;;  %p530_p10 = scmp.lt.s32.totalorder %s528_s8, %s522_s13 }
  0x40   : > { %p525_p13 = pneg %p524_p12 }
  0x41   : > { %p531_p2 = por %p530_p10, %p529_p7 }
  0x43   : > { %p532_p4 = pnand %p531_p2, %p525_p13 }
 0x10d   : > { %v289_v4 = vpop.f32.mrb[0].mxu0 }
 0x10e   : > { %v300_v5 = vmul.f32 %v289_v4, %v289_v4  ;;  %v291_v6 = vpop.f32.mrb[1].mxu0  ;;  %v295_v7 = vsel %vm294_vm1, %v289_v4, 0.0 }
 0x10f   : > { %v301_v8 = vmul.f32 %v291_v6, %v291_v6  ;;  %v296_v9 = vsel %vm294_vm1, %v291_v6, 0.0 }
 0x110   : > { %v297_v10 = vadd.f32 %v296_v9, %v295_v7  ;;  %v302_v11 = vsel %vm294_vm1, %v300_v5, 0.0 }
 0x111   : > { %v303_v12 = vsel %vm294_vm1, %v301_v8, 0.0 }
 0x112   : > { %298 = vadd.xlane.f32.xlu0 %v297_v10  ;;  %v304_v13 = vadd.f32 %v303_v12, %v302_v11 }
 0x116   : > { %305 = vadd.xlane.f32.xlu0 %v304_v13 }
 0x19f   : > { %v299_v15 = vpop.xlane.xlu0 %298 }
 0x1a0   : > { %v307_v16 = vmul.f32 0.00390625, %v299_v15 }
 0x1a2   : > { %v309_v18 = vmul.f32 %v307_v16, %v307_v16 }
 0x1a3   : > { %v306_v17 = vpop.xlane.xlu0 %305 }
 0x1a4   : > { %v308_v19 = vmul.f32 0.00390625, %v306_v17 }
 0x1a6   : > { %v310_v20 = vsub.f32 %v308_v19, %v309_v18 }
 0x1a8   : > { %v311_v21 = vmax.f32 %v310_v20, 0.0 }
 0x1aa   : > { %v312_v22 = vadd.f32 1e-05, %v311_v21 }
 0x1ac   : > { %490 = vrsqrt.f32 %v312_v22 }
 0x1b6   : > { %v491_v24 = vpop.eup %490 }
 0x1b7   : > { %v314_v25 = vmul.f32 %v491_v24, %v215_v23 }
 0x1b9   : > { %319 = vperm.xlu1 %488, %v314_v25   ;;  %v315_v27 = vmul.f32 %v314_v25, %v307_v16 }
 0x1bb   : > { %v316_v28 = vsub.f32 %v216_v26, %v315_v27 }
 0x1bd   : > { %326 = vperm.xlu1 %488, %v316_v28  }
 0x238   : > { %v320_v29 = vpop.permute.xlu1 %319 }
 0x239   : > { %v322_v30 = vmul.f32 %v320_v29, %v289_v4  ;;  %v323_v31 = vmul.f32 %v320_v29, %v291_v6 }
 0x23c   : > { %v327_v32 = vpop.permute.xlu1 %326 }
 0x23d   : > { %v329_v33 = vadd.f32 %v327_v32, %v322_v30  ;;  %v330_v34 = vadd.f32 %v327_v32, %v323_v31 }
 0x23f   : > { %v331_v35 = vmax.f32 %v329_v33, 0.0  ;;  %v332_v36 = vmax.f32 %v330_v34, 0.0 }
 0x241   : > { %v335_v37 = vcombine.low %v331_v35, %v332_v36 }
 0x243   : > { %337 = vst [vmem:[%s213_s25] sm:$0xff] %v335_v37 }
 0x244   : > { %535 = shalt.err (!%p532_p4)
}
 0x245   : > { %s536_s7 = scalar_lea.hbm %s746_s6, 128  ;;  %s540_s11 = scalar_lea.hbm %s794_s4, 256 }
 0x246   : > { %p537_p5 = scmp.ne.s32.totalorder %s746_s6, %s536_s7  ;;  %p541_p0 = scmp.lt.u32.totalorder %s746_s6, %s794_s4 }
 0x247   : > { %p542_p1 = scmp.lt.u32.totalorder %s540_s11, %s536_s7  ;;  %p544_p6 = scmp.lt.u32.totalorder %s536_s7, %s746_s6 }
 0x248   : > { %p538_p8 = pnand %p537_p5, %p803_p11 }
 0x249   : > { %p543_p3 = por %p542_p1, %p541_p0 }
 0x24a   : > { %p539_p9 = pneg %p538_p8 }
 0x24b   : > { %p545_p12 = por %p544_p6, %p543_p3 }
 0x24d   : > { %p546_p13 = pnand %p545_p12, %p539_p9 }
 0x24f   : > { %549 = shalt.err (!%p546_p13)
}
 0x250   : > { %442 = dma.vmem_to_hbm [thread:$0]  (%p803_p11), %s748_s29, 128, %s746_s6, %s339_s9  }
 0x251 PF: > { %s365_s22 = sand.u32 1, %s576_s15   ;;  %p804_p7 = scmp.ne.s32.totalorder %s799_s28, 0 }
 0x252   : > { %p805_p10 = scmp.ge.s32.totalorder %s588_s18, 2  ;;  %s366_s23 = scalar_lea.sflag [#allocation4], %s365_s22 }
 0x254   : > { %p449_p2 = pnand %p805_p10, %p804_p7 }
 0x256   : > { %571 = dma.done.wait (!%p449_p2), %s366_s23, 128  }
 0x257   : > { %573 = vsyncadd (!%p449_p2), %s366_s23, 4294967168  ;;  %p17_p4 = scmp.ge.s32.totalorder %s644_s21, 4   ;;  %s806_s15 = smov %s580_s16 }
 0x258   : > { %s807_s16 = smov %s584_s17  ;;  %s808_s17 = smov %s656_s24 }
 0x259   : > { %s809_s18 = smov %s644_s21  ;;  %19 = sbr.rel (!%p17_p4) target bundleno = 5 (0x5), region = 81 }
 0x260   :  { %371 = vsyncpa [#allocation3], 1 }
 0x261   :  { %373 = vsyncpa [#allocation3 + $0x1], 1 }
 0x262   :  { %374 = vsyncpa [#allocation4], 1 }
 0x263   :  { %376 = vsyncpa [#allocation4 + $0x1], 1 }

</bundles_post_ra>
